<compile_context>
chip_gen: v7x
topology: tpu7x:2x2x1
jax: 0.10.0
libtpu: 0.0.40
codegen_flags: <defaults>
</compile_context>

<pallas_src>
import functools

import jax
import jax.numpy as jnp
from jax.experimental import pallas as pl
from jax.experimental.pallas import tpu as pltpu

_VMEM_LIMIT = 48 * 1024 * 1024


def _layer_norm(x, gamma, beta, eps=1e-5):
    mu = jnp.mean(x, axis=-1, keepdims=True)
    var = jnp.mean((x - mu) ** 2, axis=-1, keepdims=True)
    return (x - mu) * jax.lax.rsqrt(var + eps) * gamma + beta


def encoder_stack_kernel(x_ref,
                         wqkv_ref, bqkv_ref, wo_ref, bo_ref,
                         g1_ref, bt1_ref, w1_ref, b1_ref,
                         w2_ref, b2_ref, g2_ref, bt2_ref,
                         o_ref, h_ref, *, nhead):
    """Full encoder stack for one batch element.

    Grid = (B, L).  The (S, E) activation lives in the VMEM scratch `h_ref`
    across the layer axis; weights are bf16, accumulation / LN in f32.
    """
    l = pl.program_id(1)

    @pl.when(l == 0)
    def _():
        h_ref[...] = x_ref[0].astype(jnp.float32)

    x = h_ref[...]                                        # (S, E) f32
    S, E = x.shape
    hd = E // nhead
    scale = 1.0 / jnp.sqrt(jnp.float32(hd))

    # --- self attention (head-batched, bf16 MXU operands) -------------------
    xb = x.astype(jnp.bfloat16)
    qkv = jnp.dot(xb, wqkv_ref[0],
                  preferred_element_type=jnp.float32) + bqkv_ref[0]   # (S, 3E) f32

    q = qkv[:, :E].reshape(S, nhead, hd).transpose(1, 0, 2)           # (H, S, hd)
    k = qkv[:, E:2 * E].reshape(S, nhead, hd).transpose(1, 0, 2)
    v = qkv[:, 2 * E:].reshape(S, nhead, hd).transpose(1, 0, 2)

    s = jnp.einsum('hqd,hkd->hqk',
                   q.astype(jnp.bfloat16), k.astype(jnp.bfloat16),
                   preferred_element_type=jnp.float32) * scale        # (H, S, S)
    s = s - jnp.max(s, axis=-1, keepdims=True)
    p = jnp.exp(s)
    p = p * pl.reciprocal(jnp.sum(p, axis=-1, keepdims=True), approx=True)

    ctx = jnp.einsum('hqk,hkd->hqd',
                     p.astype(jnp.bfloat16), v.astype(jnp.bfloat16),
                     preferred_element_type=jnp.float32)              # (H, S, hd)
    ctx = ctx.transpose(1, 0, 2).reshape(S, E)                        # (S, E)

    attn = jnp.dot(ctx.astype(jnp.bfloat16), wo_ref[0],
                   preferred_element_type=jnp.float32) + bo_ref[0]
    x = _layer_norm(x + attn, g1_ref[0], bt1_ref[0])

    # --- feed forward (ReLU) ------------------------------------------------
    h = jnp.dot(x.astype(jnp.bfloat16), w1_ref[0],
                preferred_element_type=jnp.float32) + b1_ref[0]
    h = jnp.maximum(h, 0.0)
    ff = jnp.dot(h.astype(jnp.bfloat16), w2_ref[0],
                 preferred_element_type=jnp.float32) + b2_ref[0]
    x = _layer_norm(x + ff, g2_ref[0], bt2_ref[0])

    h_ref[...] = x

    @pl.when(l == pl.num_programs(1) - 1)
    def _():
        o_ref[0] = h_ref[...].astype(o_ref.dtype)


def fc_kernel(x_ref, w_ref, b_ref, o_ref):
    o_ref[...] = (jnp.dot(x_ref[...].astype(jnp.bfloat16), w_ref[...],
                          preferred_element_type=jnp.float32) + b_ref[...]
                  ).astype(o_ref.dtype)


def encoder_stack(x, stacked, nhead):
    """x: (B, S, E) f32; stacked: tuple of (L, ...) per-layer params."""
    B, S, E = x.shape
    L = stacked[0].shape[0]

    def wspec(a):
        return pl.BlockSpec((1,) + a.shape[1:], lambda b, l: (l, 0, 0))

    return pl.pallas_call(
        functools.partial(encoder_stack_kernel, nhead=nhead),
        out_shape=jax.ShapeDtypeStruct((B, S, E), jnp.float32),
        grid=(B, L),
        in_specs=[pl.BlockSpec((1, S, E), lambda b, l: (b, 0, 0))]
                 + [wspec(a) for a in stacked],
        out_specs=pl.BlockSpec((1, S, E), lambda b, l: (b, 0, 0)),
        scratch_shapes=[pltpu.VMEM((S, E), jnp.float32)],
        compiler_params=pltpu.CompilerParams(
            dimension_semantics=("parallel", "arbitrary"),
            vmem_limit_bytes=_VMEM_LIMIT),
    )(x, *stacked)


def fc_matmul(x2d, w, b):
    """x2d: (N, E) f32, w: (E, V) bf16, b: (1, V) f32 -> (N, V) f32.

    2-D grid over (row tiles, vocab tiles); degenerates to one full block at
    small shapes (block == full dim is always legal).
    """
    N, E = x2d.shape
    V = w.shape[1]
    tm = 256 if (N > 256 and N % 256 == 0) else N
    tn = 512 if (V > 512 and V % 512 == 0) else V
    grid = (N // tm, V // tn)
    return pl.pallas_call(
        fc_kernel,
        out_shape=jax.ShapeDtypeStruct((N, V), jnp.float32),
        grid=grid,
        in_specs=[pl.BlockSpec((tm, E), lambda i, j: (i, 0)),
                  pl.BlockSpec((E, tn), lambda i, j: (0, j)),
                  pl.BlockSpec((1, tn), lambda i, j: (0, j))],
        out_specs=pl.BlockSpec((tm, tn), lambda i, j: (i, j)),
        compiler_params=pltpu.CompilerParams(
            dimension_semantics=("parallel", "parallel"),
            vmem_limit_bytes=_VMEM_LIMIT),
    )(x2d, w, b)


def init_params(key, vocab_size, embed_dim, num_layers):
    """Weights stacked with leading L axis; matmul weights stored bf16."""
    E, F, L = embed_dim, 4 * embed_dim, num_layers
    ks = iter(jax.random.split(key, 8))

    emb = jax.random.normal(next(ks), (vocab_size, E), jnp.float32) * 0.02
    emb = emb.at[0].set(0.0)                              # padding_idx=0

    def w(k, shape):
        return (jax.random.normal(k, shape, jnp.float32) * 0.02).astype(jnp.bfloat16)

    wqkv = w(next(ks), (L, E, 3 * E))
    bqkv = jnp.zeros((L, 1, 3 * E), jnp.float32)
    wo = w(next(ks), (L, E, E))
    bo = jnp.zeros((L, 1, E), jnp.float32)
    g1 = jnp.ones((L, 1, E), jnp.float32)
    bt1 = jnp.zeros((L, 1, E), jnp.float32)
    w1 = w(next(ks), (L, E, F))
    b1 = jnp.zeros((L, 1, F), jnp.float32)
    w2 = w(next(ks), (L, F, E))
    b2 = jnp.zeros((L, 1, E), jnp.float32)
    g2 = jnp.ones((L, 1, E), jnp.float32)
    bt2 = jnp.zeros((L, 1, E), jnp.float32)
    stacked = (wqkv, bqkv, wo, bo, g1, bt1, w1, b1, w2, b2, g2, bt2)

    wfc = w(next(ks), (E, vocab_size))
    bfc = jnp.zeros((1, vocab_size), jnp.float32)
    return emb, stacked, (wfc, bfc)


def transformer_forward(tokens, emb_table, stacked_layers, fc_params, nhead):
    # Embedding lookup (gather) kept in plain-JAX glue; padding row is zero.
    h = emb_table[tokens]                                 # (B, S, E) f32
    h = encoder_stack(h, stacked_layers, nhead)           # fused L-layer encoder
    B, S, E = h.shape
    wfc, bfc = fc_params
    logits = fc_matmul(h.reshape(B * S, E), wfc, bfc).reshape(B, S, -1)
    return logits                                         # (B, S, vocab) f32


if __name__ == "__main__":
    vocab_size, embed_dim, nhead, num_layers = 16, 32, 4, 2
    batch, seq = 2, 8

    key = jax.random.PRNGKey(0)
    k_params, k_tok = jax.random.split(key)
    emb_table, stacked_layers, fc_params = init_params(
        k_params, vocab_size, embed_dim, num_layers)

    tokens = jax.random.randint(k_tok, (batch, seq), 0, vocab_size, dtype=jnp.int32)

    logits = transformer_forward(tokens, emb_table, stacked_layers, fc_params, nhead)
    jax.block_until_ready(logits)
    assert logits.shape == (batch, seq, vocab_size)
    assert bool(jnp.all(jnp.isfinite(logits)))
    print("KERNEL_OK")
</pallas_src>

<mosaic_0001>
module attributes {stable_mosaic.version = 11 : i64} {
  func.func @encoder_stack_kernel(%arg0: i32, %arg1: i32, %arg2: memref<1x8x32xf32, #tpu.memory_space<vmem>>, %arg3: memref<1x32x96xbf16, #tpu.memory_space<vmem>>, %arg4: memref<1x1x96xf32, #tpu.memory_space<vmem>>, %arg5: memref<1x32x32xbf16, #tpu.memory_space<vmem>>, %arg6: memref<1x1x32xf32, #tpu.memory_space<vmem>>, %arg7: memref<1x1x32xf32, #tpu.memory_space<vmem>>, %arg8: memref<1x1x32xf32, #tpu.memory_space<vmem>>, %arg9: memref<1x32x128xbf16, #tpu.memory_space<vmem>>, %arg10: memref<1x1x128xf32, #tpu.memory_space<vmem>>, %arg11: memref<1x128x32xbf16, #tpu.memory_space<vmem>>, %arg12: memref<1x1x32xf32, #tpu.memory_space<vmem>>, %arg13: memref<1x1x32xf32, #tpu.memory_space<vmem>>, %arg14: memref<1x1x32xf32, #tpu.memory_space<vmem>>, %arg15: memref<1x8x32xf32, #tpu.memory_space<vmem>>, %arg16: memref<8x32xf32, #tpu.memory_space<vmem>>) attributes {dimension_semantics = [#tpu.dimension_semantics<parallel>, #tpu.dimension_semantics<arbitrary>], iteration_bounds = array<i64: 2, 2>, scalar_prefetch = 0 : i64, scratch_operands = 1 : i64, tpu.core_type = #tpu.core_type<tc>, window_params = [{transform_indices = @transform_0, window_bounds = array<i64: 1, 8, 32>}, {transform_indices = @transform_1, window_bounds = array<i64: 1, 32, 96>}, {transform_indices = @transform_2, window_bounds = array<i64: 1, 1, 96>}, {transform_indices = @transform_3, window_bounds = array<i64: 1, 32, 32>}, {transform_indices = @transform_4, window_bounds = array<i64: 1, 1, 32>}, {transform_indices = @transform_5, window_bounds = array<i64: 1, 1, 32>}, {transform_indices = @transform_6, window_bounds = array<i64: 1, 1, 32>}, {transform_indices = @transform_7, window_bounds = array<i64: 1, 32, 128>}, {transform_indices = @transform_8, window_bounds = array<i64: 1, 1, 128>}, {transform_indices = @transform_9, window_bounds = array<i64: 1, 128, 32>}, {transform_indices = @transform_10, window_bounds = array<i64: 1, 1, 32>}, {transform_indices = @transform_11, window_bounds = array<i64: 1, 1, 32>}, {transform_indices = @transform_12, window_bounds = array<i64: 1, 1, 32>}, {transform_indices = @transform_13, window_bounds = array<i64: 1, 8, 32>}]} {
    %c0_i32 = arith.constant 0 : i32
    %0 = arith.cmpi eq, %arg1, %c0_i32 : i32
    %1 = arith.extui %0 : i1 to i32
    %c0_i32_0 = arith.constant 0 : i32
    %2 = arith.cmpi ne, %1, %c0_i32_0 : i32
    scf.if %2 {
      %c0_61 = arith.constant 0 : index
      %c0_62 = arith.constant 0 : index
      %c0_63 = arith.constant 0 : index
      %127 = vector.load %arg2[%c0_61, %c0_62, %c0_63] : memref<1x8x32xf32, #tpu.memory_space<vmem>>, vector<1x8x32xf32>
      %128 = vector.shape_cast %127 : vector<1x8x32xf32> to vector<8x32xf32>
      %c0_64 = arith.constant 0 : index
      %c0_65 = arith.constant 0 : index
      %129 = vector.load %arg16[%c0_64, %c0_65] : memref<8x32xf32, #tpu.memory_space<vmem>>, vector<8x32xf32>
      tpu.vector_store %arg16[%c0_64, %c0_65], %128 {strides = array<i32>} : memref<8x32xf32, #tpu.memory_space<vmem>>, vector<8x32xf32>,
    } else {
    }
    %c0 = arith.constant 0 : index
    %c0_1 = arith.constant 0 : index
    %3 = vector.load %arg16[%c0, %c0_1] : memref<8x32xf32, #tpu.memory_space<vmem>>, vector<8x32xf32>
    %cst = arith.constant 8.000000e+00 : f32
    %4 = math.sqrt %cst : f32
    %cst_2 = arith.constant 1.000000e+00 : f32
    %5 = arith.divf %cst_2, %4 : f32
    %6 = arith.truncf %3 : vector<8x32xf32> to vector<8x32xbf16>
    %c0_3 = arith.constant 0 : index
    %c0_4 = arith.constant 0 : index
    %c0_5 = arith.constant 0 : index
    %7 = vector.load %arg3[%c0_3, %c0_4, %c0_5] : memref<1x32x96xbf16, #tpu.memory_space<vmem>>, vector<1x32x96xbf16>
    %8 = vector.shape_cast %7 : vector<1x32x96xbf16> to vector<32x96xbf16>
    %cst_6 = arith.constant dense<0.000000e+00> : vector<8x96xf32>
    %9 = tpu.matmul %6, %8, %cst_6 {dimension_numbers = #tpu.dot_dimension_numbers<[1], [0], [0], [1], [0, 0, 1, 1], [], []>} : vector<8x32xbf16>, vector<32x96xbf16>, vector<8x96xf32> -> vector<8x96xf32>
    %c0_7 = arith.constant 0 : index
    %c0_8 = arith.constant 0 : index
    %c0_9 = arith.constant 0 : index
    %10 = vector.load %arg4[%c0_7, %c0_8, %c0_9] : memref<1x1x96xf32, #tpu.memory_space<vmem>>, vector<1x1x96xf32>
    %11 = vector.shape_cast %10 : vector<1x1x96xf32> to vector<1x96xf32>
    %12 = vector.broadcast %11 : vector<1x96xf32> to vector<8x96xf32>
    %13 = arith.addf %9, %12 : vector<8x96xf32>
    %14 = vector.extract_strided_slice %13 {offsets = [0, 0], sizes = [8, 32], strides = [1, 1]} : vector<8x96xf32> to vector<8x32xf32>
    %15 = vector.shape_cast %14 : vector<8x32xf32> to vector<8x4x8xf32>
    %16 = tpu.transpose %15, [1, 0, 2] : vector<8x4x8xf32> -> vector<4x8x8xf32>
    %17 = vector.extract_strided_slice %13 {offsets = [0, 32], sizes = [8, 32], strides = [1, 1]} : vector<8x96xf32> to vector<8x32xf32>
    %18 = vector.shape_cast %17 : vector<8x32xf32> to vector<8x4x8xf32>
    %19 = tpu.transpose %18, [1, 0, 2] : vector<8x4x8xf32> -> vector<4x8x8xf32>
    %20 = vector.extract_strided_slice %13 {offsets = [0, 64], sizes = [8, 32], strides = [1, 1]} : vector<8x96xf32> to vector<8x32xf32>
    %21 = vector.shape_cast %20 : vector<8x32xf32> to vector<8x4x8xf32>
    %22 = tpu.transpose %21, [1, 0, 2] : vector<8x4x8xf32> -> vector<4x8x8xf32>
    %23 = arith.truncf %16 : vector<4x8x8xf32> to vector<4x8x8xbf16>
    %24 = arith.truncf %19 : vector<4x8x8xf32> to vector<4x8x8xbf16>
    "tpu.trace_start"() <{level = 10 : i32, message = "hqd,hkd->hqk"}> : () -> ()
    %cst_10 = arith.constant dense<0.000000e+00> : vector<4x8x8xf32>
    %25 = tpu.matmul %23, %24, %cst_10 {dimension_numbers = #tpu.dot_dimension_numbers<[2], [2], [1], [1], [0, 0, 0, 1, 1, 1], [0], [0]>} : vector<4x8x8xbf16>, vector<4x8x8xbf16>, vector<4x8x8xf32> -> vector<4x8x8xf32>
    "tpu.trace_stop"() : () -> ()
    %26 = vector.broadcast %5 : f32 to vector<4x8x8xf32>
    %27 = arith.mulf %25, %26 : vector<4x8x8xf32>
    %cst_11 = arith.constant dense<0xFF800000> : vector<4x8xf32>
    %28 = vector.multi_reduction <maximumf>, %27, %cst_11 [2] : vector<4x8x8xf32> to vector<4x8xf32>
    %29 = vector.shape_cast %28 : vector<4x8xf32> to vector<4x8x1xf32>
    %30 = vector.broadcast %29 : vector<4x8x1xf32> to vector<4x8x8xf32>
    %31 = arith.subf %27, %30 : vector<4x8x8xf32>
    %32 = math.exp %31 : vector<4x8x8xf32>
    %cst_12 = arith.constant dense<0.000000e+00> : vector<4x8xf32>
    %33 = vector.multi_reduction <add>, %32, %cst_12 [2] : vector<4x8x8xf32> to vector<4x8xf32>
    %34 = vector.shape_cast %33 : vector<4x8xf32> to vector<4x8x1xf32>
    %35 = tpu.reciprocal %34 {approx = true} : vector<4x8x1xf32> -> vector<4x8x1xf32>
    %36 = vector.broadcast %35 : vector<4x8x1xf32> to vector<4x8x8xf32>
    %37 = arith.mulf %32, %36 : vector<4x8x8xf32>
    %38 = arith.truncf %37 : vector<4x8x8xf32> to vector<4x8x8xbf16>
    %39 = arith.truncf %22 : vector<4x8x8xf32> to vector<4x8x8xbf16>
    "tpu.trace_start"() <{level = 10 : i32, message = "hqk,hkd->hqd"}> : () -> ()
    %cst_13 = arith.constant dense<0.000000e+00> : vector<4x8x8xf32>
    %40 = tpu.matmul %38, %39, %cst_13 {dimension_numbers = #tpu.dot_dimension_numbers<[2], [1], [1], [2], [0, 0, 0, 1, 1, 2], [0], [0]>} : vector<4x8x8xbf16>, vector<4x8x8xbf16>, vector<4x8x8xf32> -> vector<4x8x8xf32>
    "tpu.trace_stop"() : () -> ()
    %41 = tpu.transpose %40, [1, 0, 2] : vector<4x8x8xf32> -> vector<8x4x8xf32>
    %42 = vector.shape_cast %41 : vector<8x4x8xf32> to vector<8x32xf32>
    %43 = arith.truncf %42 : vector<8x32xf32> to vector<8x32xbf16>
    %c0_14 = arith.constant 0 : index
    %c0_15 = arith.constant 0 : index
    %c0_16 = arith.constant 0 : index
    %44 = vector.load %arg5[%c0_14, %c0_15, %c0_16] : memref<1x32x32xbf16, #tpu.memory_space<vmem>>, vector<1x32x32xbf16>
    %45 = vector.shape_cast %44 : vector<1x32x32xbf16> to vector<32x32xbf16>
    %cst_17 = arith.constant dense<0.000000e+00> : vector<8x32xf32>
    %46 = tpu.matmul %43, %45, %cst_17 {dimension_numbers = #tpu.dot_dimension_numbers<[1], [0], [0], [1], [0, 0, 1, 1], [], []>} : vector<8x32xbf16>, vector<32x32xbf16>, vector<8x32xf32> -> vector<8x32xf32>
    %c0_18 = arith.constant 0 : index
    %c0_19 = arith.constant 0 : index
    %c0_20 = arith.constant 0 : index
    %47 = vector.load %arg6[%c0_18, %c0_19, %c0_20] : memref<1x1x32xf32, #tpu.memory_space<vmem>>, vector<1x1x32xf32>
    %48 = vector.shape_cast %47 : vector<1x1x32xf32> to vector<1x32xf32>
    %49 = vector.broadcast %48 : vector<1x32xf32> to vector<8x32xf32>
    %50 = arith.addf %46, %49 : vector<8x32xf32>
    %51 = arith.addf %3, %50 : vector<8x32xf32>
    %c0_21 = arith.constant 0 : index
    %c0_22 = arith.constant 0 : index
    %c0_23 = arith.constant 0 : index
    %52 = vector.load %arg7[%c0_21, %c0_22, %c0_23] : memref<1x1x32xf32, #tpu.memory_space<vmem>>, vector<1x1x32xf32>
    %53 = vector.shape_cast %52 : vector<1x1x32xf32> to vector<1x32xf32>
    %c0_24 = arith.constant 0 : index
    %c0_25 = arith.constant 0 : index
    %c0_26 = arith.constant 0 : index
    %54 = vector.load %arg8[%c0_24, %c0_25, %c0_26] : memref<1x1x32xf32, #tpu.memory_space<vmem>>, vector<1x1x32xf32>
    %55 = vector.shape_cast %54 : vector<1x1x32xf32> to vector<1x32xf32>
    %cst_27 = arith.constant dense<0.000000e+00> : vector<8xf32>
    %56 = vector.multi_reduction <add>, %51, %cst_27 [1] : vector<8x32xf32> to vector<8xf32>
    %57 = vector.shape_cast %56 : vector<8xf32> to vector<8x1xf32>
    %cst_28 = arith.constant 3.200000e+01 : f32
    %58 = vector.broadcast %cst_28 : f32 to vector<8x1xf32>
    %59 = arith.divf %57, %58 : vector<8x1xf32>
    %60 = vector.broadcast %59 : vector<8x1xf32> to vector<8x32xf32>
    %61 = arith.subf %51, %60 : vector<8x32xf32>
    %62 = arith.mulf %61, %61 : vector<8x32xf32>
    %cst_29 = arith.constant dense<0.000000e+00> : vector<8xf32>
    %63 = vector.multi_reduction <add>, %62, %cst_29 [1] : vector<8x32xf32> to vector<8xf32>
    %64 = vector.shape_cast %63 : vector<8xf32> to vector<8x1xf32>
    %cst_30 = arith.constant 3.200000e+01 : f32
    %65 = vector.broadcast %cst_30 : f32 to vector<8x1xf32>
    %66 = arith.divf %64, %65 : vector<8x1xf32>
    %67 = vector.broadcast %59 : vector<8x1xf32> to vector<8x32xf32>
    %68 = arith.subf %51, %67 : vector<8x32xf32>
    %cst_31 = arith.constant 9.99999974E-6 : f32
    %69 = vector.broadcast %cst_31 : f32 to vector<8x1xf32>
    %70 = arith.addf %66, %69 : vector<8x1xf32>
    %71 = math.rsqrt %70 : vector<8x1xf32>
    %72 = vector.broadcast %71 : vector<8x1xf32> to vector<8x32xf32>
    %73 = arith.mulf %68, %72 : vector<8x32xf32>
    %74 = vector.broadcast %53 : vector<1x32xf32> to vector<8x32xf32>
    %75 = arith.mulf %73, %74 : vector<8x32xf32>
    %76 = vector.broadcast %55 : vector<1x32xf32> to vector<8x32xf32>
    %77 = arith.addf %75, %76 : vector<8x32xf32>
    %78 = arith.truncf %77 : vector<8x32xf32> to vector<8x32xbf16>
    %c0_32 = arith.constant 0 : index
    %c0_33 = arith.constant 0 : index
    %c0_34 = arith.constant 0 : index
    %79 = vector.load %arg9[%c0_32, %c0_33, %c0_34] : memref<1x32x128xbf16, #tpu.memory_space<vmem>>, vector<1x32x128xbf16>
    %80 = vector.shape_cast %79 : vector<1x32x128xbf16> to vector<32x128xbf16>
    %cst_35 = arith.constant dense<0.000000e+00> : vector<8x128xf32>
    %81 = tpu.matmul %78, %80, %cst_35 {dimension_numbers = #tpu.dot_dimension_numbers<[1], [0], [0], [1], [0, 0, 1, 1], [], []>} : vector<8x32xbf16>, vector<32x128xbf16>, vector<8x128xf32> -> vector<8x128xf32>
    %c0_36 = arith.constant 0 : index
    %c0_37 = arith.constant 0 : index
    %c0_38 = arith.constant 0 : index
    %82 = vector.load %arg10[%c0_36, %c0_37, %c0_38] : memref<1x1x128xf32, #tpu.memory_space<vmem>>, vector<1x1x128xf32>
    %83 = vector.shape_cast %82 : vector<1x1x128xf32> to vector<1x128xf32>
    %84 = vector.broadcast %83 : vector<1x128xf32> to vector<8x128xf32>
    %85 = arith.addf %81, %84 : vector<8x128xf32>
    %cst_39 = arith.constant 0.000000e+00 : f32
    %86 = vector.broadcast %cst_39 : f32 to vector<8x128xf32>
    %87 = arith.maximumf %85, %86 : vector<8x128xf32>
    %88 = arith.truncf %87 : vector<8x128xf32> to vector<8x128xbf16>
    %c0_40 = arith.constant 0 : index
    %c0_41 = arith.constant 0 : index
    %c0_42 = arith.constant 0 : index
    %89 = vector.load %arg11[%c0_40, %c0_41, %c0_42] : memref<1x128x32xbf16, #tpu.memory_space<vmem>>, vector<1x128x32xbf16>
    %90 = vector.shape_cast %89 : vector<1x128x32xbf16> to vector<128x32xbf16>
    %cst_43 = arith.constant dense<0.000000e+00> : vector<8x32xf32>
    %91 = tpu.matmul %88, %90, %cst_43 {dimension_numbers = #tpu.dot_dimension_numbers<[1], [0], [0], [1], [0, 0, 1, 1], [], []>} : vector<8x128xbf16>, vector<128x32xbf16>, vector<8x32xf32> -> vector<8x32xf32>
    %c0_44 = arith.constant 0 : index
    %c0_45 = arith.constant 0 : index
    %c0_46 = arith.constant 0 : index
    %92 = vector.load %arg12[%c0_44, %c0_45, %c0_46] : memref<1x1x32xf32, #tpu.memory_space<vmem>>, vector<1x1x32xf32>
    %93 = vector.shape_cast %92 : vector<1x1x32xf32> to vector<1x32xf32>
    %94 = vector.broadcast %93 : vector<1x32xf32> to vector<8x32xf32>
    %95 = arith.addf %91, %94 : vector<8x32xf32>
    %96 = arith.addf %77, %95 : vector<8x32xf32>
    %c0_47 = arith.constant 0 : index
    %c0_48 = arith.constant 0 : index
    %c0_49 = arith.constant 0 : index
    %97 = vector.load %arg13[%c0_47, %c0_48, %c0_49] : memref<1x1x32xf32, #tpu.memory_space<vmem>>, vector<1x1x32xf32>
    %98 = vector.shape_cast %97 : vector<1x1x32xf32> to vector<1x32xf32>
    %c0_50 = arith.constant 0 : index
    %c0_51 = arith.constant 0 : index
    %c0_52 = arith.constant 0 : index
    %99 = vector.load %arg14[%c0_50, %c0_51, %c0_52] : memref<1x1x32xf32, #tpu.memory_space<vmem>>, vector<1x1x32xf32>
    %100 = vector.shape_cast %99 : vector<1x1x32xf32> to vector<1x32xf32>
    %cst_53 = arith.constant dense<0.000000e+00> : vector<8xf32>
    %101 = vector.multi_reduction <add>, %96, %cst_53 [1] : vector<8x32xf32> to vector<8xf32>
    %102 = vector.shape_cast %101 : vector<8xf32> to vector<8x1xf32>
    %cst_54 = arith.constant 3.200000e+01 : f32
    %103 = vector.broadcast %cst_54 : f32 to vector<8x1xf32>
    %104 = arith.divf %102, %103 : vector<8x1xf32>
    %105 = vector.broadcast %104 : vector<8x1xf32> to vector<8x32xf32>
    %106 = arith.subf %96, %105 : vector<8x32xf32>
    %107 = arith.mulf %106, %106 : vector<8x32xf32>
    %cst_55 = arith.constant dense<0.000000e+00> : vector<8xf32>
    %108 = vector.multi_reduction <add>, %107, %cst_55 [1] : vector<8x32xf32> to vector<8xf32>
    %109 = vector.shape_cast %108 : vector<8xf32> to vector<8x1xf32>
    %cst_56 = arith.constant 3.200000e+01 : f32
    %110 = vector.broadcast %cst_56 : f32 to vector<8x1xf32>
    %111 = arith.divf %109, %110 : vector<8x1xf32>
    %112 = vector.broadcast %104 : vector<8x1xf32> to vector<8x32xf32>
    %113 = arith.subf %96, %112 : vector<8x32xf32>
    %cst_57 = arith.constant 9.99999974E-6 : f32
    %114 = vector.broadcast %cst_57 : f32 to vector<8x1xf32>
    %115 = arith.addf %111, %114 : vector<8x1xf32>
    %116 = math.rsqrt %115 : vector<8x1xf32>
    %117 = vector.broadcast %116 : vector<8x1xf32> to vector<8x32xf32>
    %118 = arith.mulf %113, %117 : vector<8x32xf32>
    %119 = vector.broadcast %98 : vector<1x32xf32> to vector<8x32xf32>
    %120 = arith.mulf %118, %119 : vector<8x32xf32>
    %121 = vector.broadcast %100 : vector<1x32xf32> to vector<8x32xf32>
    %122 = arith.addf %120, %121 : vector<8x32xf32>
    %c0_58 = arith.constant 0 : index
    %c0_59 = arith.constant 0 : index
    %123 = vector.load %arg16[%c0_58, %c0_59] : memref<8x32xf32, #tpu.memory_space<vmem>>, vector<8x32xf32>
    tpu.vector_store %arg16[%c0_58, %c0_59], %122 {strides = array<i32>} : memref<8x32xf32, #tpu.memory_space<vmem>>, vector<8x32xf32>,
    %c1_i32 = arith.constant 1 : i32
    %124 = arith.cmpi eq, %arg1, %c1_i32 : i32
    %125 = arith.extui %124 : i1 to i32
    %c0_i32_60 = arith.constant 0 : i32
    %126 = arith.cmpi ne, %125, %c0_i32_60 : i32
    scf.if %126 {
      %c0_61 = arith.constant 0 : index
      %c0_62 = arith.constant 0 : index
      %127 = vector.load %arg16[%c0_61, %c0_62] : memref<8x32xf32, #tpu.memory_space<vmem>>, vector<8x32xf32>
      %c0_63 = arith.constant 0 : index
      %c0_64 = arith.constant 0 : index
      %c0_65 = arith.constant 0 : index
      %128 = vector.load %arg15[%c0_63, %c0_64, %c0_65] : memref<1x8x32xf32, #tpu.memory_space<vmem>>, vector<1x8x32xf32>
      %129 = vector.shape_cast %128 : vector<1x8x32xf32> to vector<8x32xf32>
      %130 = vector.shape_cast %127 : vector<8x32xf32> to vector<1x8x32xf32>
      tpu.vector_store %arg15[%c0_63, %c0_64, %c0_65], %130 {strides = array<i32>} : memref<1x8x32xf32, #tpu.memory_space<vmem>>, vector<1x8x32xf32>,
    } else {
    }
    return
  }
  func.func @transform_0(%arg0: i32, %arg1: i32) -> (i32, i32, i32) {
    %c0_i32 = arith.constant 0 : i32
    %c0_i32_0 = arith.constant 0 : i32
    %c0_i32_1 = arith.constant 0 : i32
    return %arg0, %c0_i32, %c0_i32_0 : i32, i32, i32
  }
  func.func @transform_1(%arg0: i32, %arg1: i32) -> (i32, i32, i32) {
    %c0_i32 = arith.constant 0 : i32
    %c0_i32_0 = arith.constant 0 : i32
    %c0_i32_1 = arith.constant 0 : i32
    return %arg1, %c0_i32, %c0_i32_0 : i32, i32, i32
  }
  func.func @transform_2(%arg0: i32, %arg1: i32) -> (i32, i32, i32) {
    %c0_i32 = arith.constant 0 : i32
    %c0_i32_0 = arith.constant 0 : i32
    %c0_i32_1 = arith.constant 0 : i32
    return %arg1, %c0_i32, %c0_i32_0 : i32, i32, i32
  }
  func.func @transform_3(%arg0: i32, %arg1: i32) -> (i32, i32, i32) {
    %c0_i32 = arith.constant 0 : i32
    %c0_i32_0 = arith.constant 0 : i32
    %c0_i32_1 = arith.constant 0 : i32
    return %arg1, %c0_i32, %c0_i32_0 : i32, i32, i32
  }
  func.func @transform_4(%arg0: i32, %arg1: i32) -> (i32, i32, i32) {
    %c0_i32 = arith.constant 0 : i32
    %c0_i32_0 = arith.constant 0 : i32
    %c0_i32_1 = arith.constant 0 : i32
    return %arg1, %c0_i32, %c0_i32_0 : i32, i32, i32
  }
  func.func @transform_5(%arg0: i32, %arg1: i32) -> (i32, i32, i32) {
    %c0_i32 = arith.constant 0 : i32
    %c0_i32_0 = arith.constant 0 : i32
    %c0_i32_1 = arith.constant 0 : i32
    return %arg1, %c0_i32, %c0_i32_0 : i32, i32, i32
  }
  func.func @transform_6(%arg0: i32, %arg1: i32) -> (i32, i32, i32) {
    %c0_i32 = arith.constant 0 : i32
    %c0_i32_0 = arith.constant 0 : i32
    %c0_i32_1 = arith.constant 0 : i32
    return %arg1, %c0_i32, %c0_i32_0 : i32, i32, i32
  }
  func.func @transform_7(%arg0: i32, %arg1: i32) -> (i32, i32, i32) {
    %c0_i32 = arith.constant 0 : i32
    %c0_i32_0 = arith.constant 0 : i32
    %c0_i32_1 = arith.constant 0 : i32
    return %arg1, %c0_i32, %c0_i32_0 : i32, i32, i32
  }
  func.func @transform_8(%arg0: i32, %arg1: i32) -> (i32, i32, i32) {
    %c0_i32 = arith.constant 0 : i32
    %c0_i32_0 = arith.constant 0 : i32
    %c0_i32_1 = arith.constant 0 : i32
    return %arg1, %c0_i32, %c0_i32_0 : i32, i32, i32
  }
  func.func @transform_9(%arg0: i32, %arg1: i32) -> (i32, i32, i32) {
    %c0_i32 = arith.constant 0 : i32
    %c0_i32_0 = arith.constant 0 : i32
    %c0_i32_1 = arith.constant 0 : i32
    return %arg1, %c0_i32, %c0_i32_0 : i32, i32, i32
  }
  func.func @transform_10(%arg0: i32, %arg1: i32) -> (i32, i32, i32) {
    %c0_i32 = arith.constant 0 : i32
    %c0_i32_0 = arith.constant 0 : i32
    %c0_i32_1 = arith.constant 0 : i32
    return %arg1, %c0_i32, %c0_i32_0 : i32, i32, i32
  }
  func.func @transform_11(%arg0: i32, %arg1: i32) -> (i32, i32, i32) {
    %c0_i32 = arith.constant 0 : i32
    %c0_i32_0 = arith.constant 0 : i32
    %c0_i32_1 = arith.constant 0 : i32
    return %arg1, %c0_i32, %c0_i32_0 : i32, i32, i32
  }
  func.func @transform_12(%arg0: i32, %arg1: i32) -> (i32, i32, i32) {
    %c0_i32 = arith.constant 0 : i32
    %c0_i32_0 = arith.constant 0 : i32
    %c0_i32_1 = arith.constant 0 : i32
    return %arg1, %c0_i32, %c0_i32_0 : i32, i32, i32
  }
  func.func @transform_13(%arg0: i32, %arg1: i32) -> (i32, i32, i32) {
    %c0_i32 = arith.constant 0 : i32
    %c0_i32_0 = arith.constant 0 : i32
    %c0_i32_1 = arith.constant 0 : i32
    return %arg0, %c0_i32, %c0_i32_0 : i32, i32, i32
  }
}

</mosaic_0001>

<bundles_post_ra>
// kernel: tpu_custom_call.1
= control target key start
LH: loop header
LB: loop body
LE: loop exit
PB: predicated region body
PF: predicated region fallthrough
CT: control target
= control target key end

     0   :  { %s3196_s0 = inlined_call_operand.vmem [shape: f32[2,8,32], index: 0, kind: input, shape index: {}]   ;;  %s3197_s1 = inlined_call_operand.vmem [shape: bf16[2,32,96], index: 1, kind: input, shape index: {}]   ;;  %s3198_s2 = inlined_call_operand.vmem [shape: f32[2,1,96], index: 2, kind: input, shape index: {}]   ;;  %s3199_s3 = inlined_call_operand.vmem [shape: bf16[2,32,32], index: 3, kind: input, shape index: {}]   ;;  %s3200_s4 = inlined_call_operand.vmem [shape: f32[2,1,32], index: 4, kind: input, shape index: {}]   ;;  %s3201_s5 = inlined_call_operand.vmem [shape: f32[2,1,32], index: 5, kind: input, shape index: {}]   ;;  %s3202_s6 = inlined_call_operand.vmem [shape: f32[2,1,32], index: 6, kind: input, shape index: {}]   ;;  %s3203_s7 = inlined_call_operand.vmem [shape: bf16[2,32,128], index: 7, kind: input, shape index: {}]   ;;  %s3204_s8 = inlined_call_operand.vmem [shape: f32[2,1,128], index: 8, kind: input, shape index: {}]   ;;  %s3205_s9 = inlined_call_operand.vmem [shape: bf16[2,128,32], index: 9, kind: input, shape index: {}]   ;;  %s3206_s10 = inlined_call_operand.vmem [shape: f32[2,1,32], index: 10, kind: input, shape index: {}]   ;;  %s3207_s11 = inlined_call_operand.vmem [shape: f32[2,1,32], index: 11, kind: input, shape index: {}]   ;;  %s3208_s12 = inlined_call_operand.vmem [shape: f32[2,1,32], index: 12, kind: input, shape index: {}]   ;;  %s3209_s13 = inlined_call_operand.hbm [shape: f32[2,8,32], index: 13, kind: output, shape index: {}]  }
   0x1   :  { %3225 = sst [smem:[#allocation19_spill]] %s3196_s0 }
   0x2   :  { %3226 = sst [smem:[#allocation20_spill]] %s3197_s1 }
   0x3   :  { %3227 = sst [smem:[#allocation21_spill]] %s3199_s3 }
   0x4   :  { %3228 = sst [smem:[#allocation22_spill]] %s3203_s7 }
   0x5   :  { %3229 = sst [smem:[#allocation23_spill]] %s3208_s12 }
   0x6   :  { %3230 = sst [smem:[#allocation24_spill]] %s3209_s13 }
   0x7   :  { %18 = vsyncpa [#allocation4], 0 }
   0x8   :  { %20 = vsyncpa [#allocation4 + $0x1], 0  ;;  %s2753_s25 = smov 0   ;;  %s2755_s26 = smov 0  }
   0x9   :  { %s2757_s27 = smov 0   ;;  %s2759_s28 = smov 0  }
   0xa   :  { %s2761_s29 = smov 0   ;;  %s2763_s30 = smov 0  }
   0xb   :  { %s2765_s14 = smov 0   ;;  %s2767_s15 = smov 0  }
   0xc LB: > { %3231 = sst [smem:[#allocation6_spill]] %s2640_s25  ;;  %s2265_s16 = sadd.s32 4294967295, %s2668_s15   ;;  %s2668_s15 = sphi %s2767_s15, %s26_s15   ;;  %s2664_s14 = sphi %s2765_s14, %s3272_s14   ;;  %s2660_s30 = sphi %s2763_s30, %s3271_s30   ;;  %s2656_s29 = sphi %s2761_s29, %s3270_s29   ;;  %s2652_s28 = sphi %s2759_s28, %s3269_s28   ;;  %s2648_s27 = sphi %s2757_s27, %s3268_s27   ;;  %s2644_s26 = sphi %s2755_s26, %s3267_s26   ;;  %s2640_s25 = sphi %s2753_s25, %s3266_s25  }
   0xd   : > { %3232 = sst [smem:[#allocation7_spill]] %s2644_s26  ;;  %s2266_s17 = sadd.s32 4294967294, %s2668_s15  }
   0xe   : > { %3233 = sst [smem:[#allocation8_spill]] %s2648_s27  ;;  %s35_s18 = sadd.s32 1, %s2660_s30 }
   0xf   : > { %3234 = sst [smem:[#allocation9_spill]] %s2652_s28  ;;  %p36_p0 = scmp.ge.s32.totalorder %s35_s18, 2 }
  0x10   : > { %3235 = sst [smem:[#allocation10_spill]] %s2656_s29  ;;  %s38_s19 = sadd.s32 1, %s2664_s14 }
  0x11   : > { %3236 = sst [smem:[#allocation11_spill]] %s2660_s30  ;;  %p393_p1 = scmp.ne.s32.totalorder %s2648_s27, %s2644_s26 }
  0x12   : > { %3237 = sst [smem:[#allocation12_spill]] %s2664_s14  ;;  %p394_p2 = scmp.eq.s32.totalorder %s2265_s16, 3 }
  0x13   : > { %3238 = sst [smem:[#allocation13_spill]] %s2668_s15  ;;  %s3274_s18 = smov (%p36_p0, %s35_s18), 0 }
  0x14   : > { %3239 = sst [smem:[#allocation14_spill]] %s3274_s18  ;;  %s3276_s19 = smov (!%p36_p0, %s38_s19), %s2664_s14 }
  0x15   : > { %p2802_p3 = por %p394_p2, %p393_p1  ;;  %p399_p4 = scmp.ne.s32.totalorder %s2644_s26, %s2640_s25 }
  0x16   : > { %p40_p5 = scmp.ge.s32.totalorder %s3276_s19, 2  ;;  %p400_p6 = scmp.eq.s32.totalorder %s2266_s17, 3 }
  0x17   : > { %s3240_s20 = scalar_select %p2802_p3, 1, 0 }
  0x18   : > { %p2269_p7 = scmp.ge.s32.totalorder %s2668_s15, 1  ;;  %p505_p8 = scmp.lt.s32.totalorder %s2668_s15, 5 }
  0x19   : > { %3241 = sst [smem:[#allocation15_spill]] %s3240_s20  ;;  %s3278_s19 = smov (%p40_p5, %s3276_s19), 0 }
  0x1a   : > { %3242 = sst [smem:[#allocation16_spill]] %s3278_s19  ;;  %p2812_p9 = por %p400_p6, %p399_p4 }
  0x1b   : > { %p506_p10 = pnand %p2269_p7, %p505_p8  ;;  %s380_s22 = ssub.s32 %s2664_s14, %s3278_s19 }
  0x1c   : > { %s3243_s21 = scalar_select %p2812_p9, 1, 0 }
  0x1d   : > { %s383_s23 = sadd.s32 1, %s2648_s27  ;;  %p381_p11 = scmp.eq.s32.totalorder %s380_s22, 0 }
  0x1e   : > { %3244 = sst [smem:[#allocation17_spill]] %s3243_s21  ;;  %509 = sbr.rel (%p506_p10) target bundleno = 2800 (0xaf0), region = 72 }
  0x1f   : > { %s2820_s24 = scalar_select %p381_p11, %s2648_s27, %s383_s23  }
  0x20   : > { %s3212_s16 = sand.u32 (!%p506_p10), 1, %s2644_s26   ;;  %p592_p12 = scmp.lt.s32.totalorder (!%p506_p10), %s2656_s29, 1 }
  0x21   : > { %3245 = sst [smem:[#allocation18_spill]] %s2820_s24  ;;  %s2826_s17 = sshll.u32 (!%p506_p10), %s3212_s16, 3 }
  0x22   : > { %p596_p13 = scmp.lt.s32.totalorder (!%p506_p10), %s2652_s28, 1  ;;  %s3246_s0 = sld [smem:[#allocation19_spill]] (!%p506_p10) }
  0x23   : > { %s3247_s1 = sld [smem:[#allocation20_spill]] (!%p506_p10)  ;;  %s3248_s3 = sld [smem:[#allocation21_spill]] (!%p506_p10) }
  0x24   : > { %s3249_s7 = sld [smem:[#allocation22_spill]] (!%p506_p10)  ;;  %s3250_s24 = sld [smem:[#allocation23_spill]] (!%p506_p10) }
  0x25   : > { %s593_s18 = scalar_select %p592_p12, %s2656_s29, 1 }
  0x26   : > { %s2831_s30 = scalar_select %p596_p13, %s2652_s28, 1 }
  0x27   : > { %s2271_s22 = sshll.u32 %s593_s18, 3  ;;  %s591_s26 = scalar_lea.vmem [#allocation3], %s2826_s17 }
  0x28   : > { %s595_s16 = scalar_lea.vmem %s3246_s0, %s2271_s22  ;;  %s2327_s14 = sshll.u32 %s2831_s30, 4 }
  0x29   : > { %s600_s21 = scalar_lea.vmem %s3247_s1, %s2327_s14  ;;  %s2847_s29 = scalar_lea.vmem %s3248_s3, %s2327_s14 }
  0x2a   : > { %s2864_s15 = scalar_lea.vmem %s3249_s7, %s2327_s14  ;;  %s625_s13 = scalar_lea.vmem %s3204_s8, %s2831_s30 }
  0x2b   : > { %s2330_s3 = sshll.u32 %s2831_s30, 6  ;;  %s633_s19 = scalar_lea.vmem %s3206_s10, %s2831_s30 }
  0x2c   : > { %s2878_s0 = scalar_lea.vmem %s3205_s9, %s2330_s3  ;;  %s636_s1 = scalar_lea.vmem %s3207_s11, %s2831_s30 }
  0x2d   : > { %s639_s7 = scalar_lea.vmem %s3250_s24, %s2831_s30  ;;  %s3251_s20 = sld [smem:[#allocation9_spill]] }
  0x33   : > { %p2280_p0 = scmp.ne.s32.totalorder %s3251_s20, 0 }
  0x34   : > { %v645_v0 = vld [vmem:[%s595_s16] sm:$0xff] (!%p2280_p0)  ;;  %vm646_vm0 = vcmask (!%p2280_p0), 261120  }
  0x35   : > { %644 = sbr.rel (%p2280_p0) target bundleno = 60 (0x3c), region = 76  ;;  %647 = vst.msk [vmem:[#allocation2] sm:$0xff] (!%p2280_p0), %vm646_vm0, %v645_v0 }
  0x3c PF: > { %v2540_v1 = vld [vmem:[%s600_s21] sm:$0xff]   ;;  %v2670_v2 = vmov 0.0   ;;  %v2541_v3 = vld [vmem:[%s600_s21 + $0x8] sm:$0xff]   ;;  %vm2671_vm1 = vmmov 0   ;;  %vm673_vm2 = vcmask 261120   ;;  %s3252_s16 = scalar_lea.vmem %s3198_s2, %s2831_s30  ;;  %s2672_s24 = smov 104   ;;  %v732_v17 = vlaneseq }
  0x3d   : > { %2365 = vmatprep.subr.bf16.mxu0 %v2670_v2  ;;  %2385 = vmatprep.subr.bf16.mxu1 %v2670_v2  ;;  %v2894_v4 = vld [vmem:[#allocation2] sm:$0xff]  ;;  %s2673_s28 = smov 120   ;;  %s2674_s18 = smov 96   ;;  %v2676_v15 = vmov 1983009808   ;;  %vm1167_vm3 = vcmask 64512  }
  0x3e   : > { %2366 = vmatpush3.bf16.msra.mxu0 %v2540_v1  ;;  %2369 = vmatprep.mubr.msk.bf16.mxu0 %vm2671_vm1, %v2670_v2  ;;  %v649_v5 = vpack.c.bf16 %v2894_v4, %v2894_v4  ;;  %v2281_v6 = vld [vmem:[%s3252_s16] ss:$0 sm:$0xff]  ;;  %s2675_s23 = smov 112   ;;  %v730_v16 = vunpack.c.l.s4 %v2676_v15  ;;  %v733_v19 = vshrl.u32 %v732_v17, 7  ;;  %v2677_v20 = vmov 1934713408   ;;  %s3253_s20 = scalar_lea.vmem %s3200_s4, %s2831_s30 }
  0x3f   : > { %2367 = vmatprep.subr.bf16.mxu0 %v2670_v2  ;;  %2387 = vmatprep.mubr.msk.bf16.mxu1 %vm2671_vm1, %v2670_v2  ;;  %v762_v21 = vunpack.c.l.s4 %v2677_v20  ;;  %s2678_s22 = smov 64   ;;  %vm1411_vm4 = vcmask 1043456   ;;  %s2680_s12 = smov 8   ;;  %vm1742_vm5 = vcmask 130048   ;;  %vm1744_vm6 = vcmask 195584  }
  0x40   : > { %v731_v18 = vunpack.c.0.s8 %v730_v16  ;;  %s2681_s27 = smov 24   ;;  %s3254_s21 = scalar_lea.vmem %s3201_s5, %s2831_s30 }
  0x41   : > { %v763_v27 = vunpack.c.0.s8 %v762_v21  ;;  %s3257_s14 = sld [smem:[#allocation9_spill]] }
  0x42   : > { %2368 = vmatpush3.bf16.msra.mxu0 %v2541_v3  ;;  %v2929_v24 = vsub.s32 %v731_v18, %v733_v19 }
  0x43   : > { %2373 = vmatprep.subr.bf16.mxu0 %v2670_v2  ;;  %v2939_v34 = vsub.s32 %v763_v27, %v733_v19 }
  0x45   : > { %2370 = vmatmul.mubr.msk.bf16.vlgmr.msra.gmra.mrb[0].mxu0 %vm673_vm2, %v649_v5 }
  0x46   : > { %2375 = vmatprep.mubr.msk.bf16.mxu0 %vm2671_vm1, %v2670_v2 }
  0x47   : > { %p2322_p1 = scmp.ne.s32.totalorder %s3257_s14, 1 }
 0x118   : > { %v711_v7 = vpop.f32.mrb[0].mxu0 }
 0x119   : > { %v2910_v8 = vadd.f32 %v2281_v6, %v711_v7  ;;  %v2371_v9 = vpop.f32.mrb[1].mxu0 }
 0x11a   : > { %v714_v10 = vpop.f32.mrb[2].mxu0 }
 0x11b   : > { %724 = vrot.lane.b32.xlu1 %v2910_v8, %s2672_s24  ;;  %718 = vrot.lane.b32.xlu0 %v2910_v8, %s2673_s28  ;;  %v2372_v11 = vpop.f32.mrb[3].mxu0  ;;  %s3255_s28 = scalar_lea.vmem %s3202_s6, %s2831_s30 }
 0x11f   : > { %863 = vrot.lane.b32.xlu1 %v2910_v8, %s2674_s18  ;;  %721 = vrot.lane.b32.xlu0 %v2910_v8, %s2675_s23 }
 0x18d   : > { %v2916_v12 = vpop.permute.xlu0 %718  ;;  %v2919_v13 = vpop.permute.xlu1 %724 }
 0x18e   : > { %865 = vrot.lane.b32.xlu0 %v2916_v12, %s2674_s18  ;;  %v743_v25 = vcombine.low %v2916_v12, %v2919_v13  ;;  %v744_v26 = vcombine.high %v2916_v12, %v2919_v13 }
 0x190   : > { %v751_v30 = vrot.slane %v743_v25, %v2929_v24  ;;  %v758_v31 = vrot.slane %v744_v26, %v2929_v24 }
 0x191   : > { %v2921_v14 = vpop.permute.xlu0 %721  ;;  %v864_v32 = vpop.permute.xlu1 %863 }
 0x192   : > { %869 = vrot.lane.b32.xlu0 %v2919_v13, %s2674_s18  ;;  %867 = vrot.lane.b32.xlu1 %v2921_v14, %s2674_s18  ;;  %v727_v22 = vcombine.low %v2910_v8, %v2921_v14  ;;  %v728_v23 = vcombine.high %v2910_v8, %v2921_v14 }
 0x194   : > { %v735_v28 = vrot.slane %v727_v22, %v2929_v24  ;;  %v742_v29 = vrot.slane %v728_v23, %v2929_v24 }
 0x196   : > { %v759_v35 = vcombine.low %v735_v28, %v751_v30  ;;  %v760_v36 = vcombine.high %v735_v28, %v751_v30  ;;  %v775_v37 = vcombine.low %v742_v29, %v758_v31  ;;  %v776_v38 = vcombine.high %v742_v29, %v758_v31 }
 0x198   : > { %v767_v45 = vrot.slane %v759_v35, %v2939_v34  ;;  %v774_v46 = vrot.slane %v760_v36, %v2939_v34  ;;  %v783_v47 = vrot.slane %v775_v37, %v2939_v34  ;;  %v790_v48 = vrot.slane %v776_v38, %v2939_v34 }
 0x19a   : > { %v795_v57 = vcombine.low %v767_v45, %v774_v46  ;;  %v2285_v58 = vcombine.high %v767_v45, %v774_v46  ;;  %v811_v59 = vcombine.low %v783_v47, %v790_v48  ;;  %v2286_v60 = vcombine.high %v783_v47, %v790_v48 }
 0x19c   : > { %v802_v7 = vrot.slane %v795_v57, %v2929_v24  ;;  %v810_v9 = vrot.slane %v2285_v58, %v2929_v24  ;;  %v818_v10 = vrot.slane %v811_v59, %v2929_v24  ;;  %v826_v11 = vrot.slane %v2286_v60, %v2929_v24 }
 0x19e   : > { %v827_v23 = vcombine.low %v802_v7, %v810_v9  ;;  %v843_v25 = vcombine.low %v818_v10, %v826_v11  ;;  %v828_v26 = vcombine.high %v802_v7, %v810_v9  ;;  %v844_v27 = vcombine.high %v818_v10, %v826_v11 }
 0x1a0   : > { %v835_v35 = vrot.slane %v827_v23, %v2939_v34  ;;  %v851_v36 = vrot.slane %v843_v25, %v2939_v34 }
 0x200   : > { %v866_v33 = vpop.permute.xlu0 %865 }
 0x204   : > { %v868_v39 = vpop.permute.xlu1 %867  ;;  %v870_v40 = vpop.permute.xlu0 %869 }
 0x205   : > { %v875_v41 = vcombine.low %v864_v32, %v868_v39  ;;  %v876_v42 = vcombine.high %v864_v32, %v868_v39  ;;  %v891_v43 = vcombine.low %v866_v33, %v870_v40  ;;  %v892_v44 = vcombine.high %v866_v33, %v870_v40 }
 0x206   : > { %v842_v39 = vrot.slane %v828_v26, %v2939_v34  ;;  %v858_v40 = vrot.slane %v844_v27, %v2939_v34 }
 0x207   : > { %v883_v49 = vrot.slane %v875_v41, %v2929_v24  ;;  %v890_v50 = vrot.slane %v876_v42, %v2929_v24  ;;  %v899_v51 = vrot.slane %v891_v43, %v2929_v24  ;;  %v906_v52 = vrot.slane %v892_v44, %v2929_v24 }
 0x208   : > { %v859_v44 = vcombine.low %v835_v35, %v851_v36  ;;  %v861_v45 = vcombine.low %v842_v39, %v858_v40 }
 0x209   : > { %v907_v53 = vcombine.low %v883_v49, %v899_v51  ;;  %v908_v54 = vcombine.high %v883_v49, %v899_v51  ;;  %v923_v55 = vcombine.low %v890_v50, %v906_v52  ;;  %v924_v56 = vcombine.high %v890_v50, %v906_v52 }
 0x20a   : > { %v1159_v47 = vpack.c.bf16 %v859_v44, %v859_v44  ;;  %v1161_v48 = vpack.c.bf16 %v861_v45, %v861_v45  ;;  %v860_v51 = vcombine.high %v835_v35, %v851_v36 }
 0x20b   : > { %v915_v61 = vrot.slane %v907_v53, %v2939_v34  ;;  %v922_v62 = vrot.slane %v908_v54, %v2939_v34  ;;  %v931_v63 = vrot.slane %v923_v55, %v2939_v34  ;;  %v938_v0 = vrot.slane %v924_v56, %v2939_v34 }
 0x20c   : > { %v1160_v53 = vpack.c.bf16 %v860_v51, %v860_v51  ;;  %v862_v55 = vcombine.high %v842_v39, %v858_v40 }
 0x20d   : > { %v943_v1 = vcombine.low %v915_v61, %v922_v62  ;;  %v2287_v3 = vcombine.high %v915_v61, %v922_v62  ;;  %v959_v5 = vcombine.low %v931_v63, %v938_v0  ;;  %v2288_v6 = vcombine.high %v931_v63, %v938_v0 }
 0x20e   : > { %v1162_v56 = vpack.c.bf16 %v862_v55, %v862_v55 }
 0x20f   : > { %v950_v15 = vrot.slane %v943_v1, %v2929_v24  ;;  %v958_v16 = vrot.slane %v2287_v3, %v2929_v24  ;;  %v966_v17 = vrot.slane %v959_v5, %v2929_v24  ;;  %v974_v18 = vrot.slane %v2288_v6, %v2929_v24 }
 0x211   : > { %v975_v19 = vcombine.low %v950_v15, %v958_v16  ;;  %v991_v20 = vcombine.low %v966_v17, %v974_v18  ;;  %v976_v21 = vcombine.high %v950_v15, %v958_v16  ;;  %v992_v22 = vcombine.high %v966_v17, %v974_v18 }
 0x213   : > { %v983_v28 = vrot.slane %v975_v19, %v2939_v34  ;;  %v999_v29 = vrot.slane %v991_v20, %v2939_v34  ;;  %v990_v30 = vrot.slane %v976_v21, %v2939_v34  ;;  %v1006_v31 = vrot.slane %v992_v22, %v2939_v34 }
 0x215   : > { %v1007_v32 = vcombine.low %v983_v28, %v999_v29  ;;  %v1009_v33 = vcombine.low %v990_v30, %v1006_v31  ;;  %v1008_v43 = vcombine.high %v983_v28, %v999_v29  ;;  %v1010_v50 = vcombine.high %v990_v30, %v1006_v31 }
 0x217   : > { %v1163_v37 = vpack.c.bf16 %v1007_v32, %v1007_v32  ;;  %v1165_v38 = vpack.c.bf16 %v1009_v33, %v1009_v33  ;;  %v1164_v46 = vpack.c.bf16 %v1008_v43, %v1008_v43  ;;  %v1166_v52 = vpack.c.bf16 %v1010_v50, %v1010_v50 }
 0x219   : > { %v1172_v41 = vsel %vm1167_vm3, %v1163_v37, 0  ;;  %v1264_v42 = vsel %vm1167_vm3, %v1165_v38, 0  ;;  %v1218_v49 = vsel %vm1167_vm3, %v1164_v46, 0  ;;  %v1310_v54 = vsel %vm1167_vm3, %v1166_v52, 0 }
 0x21a   : > { %2374 = vmatpush3.bf16.xpose.msra.mxu0 %v1172_v41  ;;  %2386 = vmatpush3.bf16.xpose.msra.mxu1 %v1264_v42 }
 0x21b   : > { %2379 = vmatprep.subr.bf16.mxu0 %v2670_v2  ;;  %2397 = vmatprep.subr.bf16.mxu1 %v2670_v2 }
 0x221   : > { %2376 = vmatmul.mubr.msk.bf16.vlgmr.msra.gmra.mrb[4].mxu0 %vm1167_vm3, %v1159_v47  ;;  %2388 = vmatmul.mubr.msk.bf16.vlgmr.msra.gmra.mrb[0].mxu1 %vm1167_vm3, %v1161_v48 }
 0x222   : > { %2380 = vmatpush3.bf16.xpose.msra.mxu0 %v1218_v49  ;;  %2381 = vmatprep.mubr.msk.bf16.mxu0 %vm2671_vm1, %v2670_v2 }
 0x223   : > { %2391 = vmatprep.subr.bf16.mxu0 %v2670_v2  ;;  %2399 = vmatprep.mubr.msk.bf16.mxu1 %vm2671_vm1, %v2670_v2 }
 0x229   : > { %2382 = vmatmul.mubr.msk.bf16.vlgmr.msra.gmra.mrb[8].mxu0 %vm1167_vm3, %v1160_v53 }
 0x22a   : > { %2392 = vmatpush3.bf16.xpose.msra.mxu0 %v1310_v54  ;;  %2393 = vmatprep.mubr.msk.bf16.mxu0 %vm2671_vm1, %v2670_v2 }
 0x22b   : > { %2403 = vmatprep.subr.bf16.mxu0 %v2670_v2 }
 0x231   : > { %2394 = vmatmul.mubr.msk.bf16.vlgmr.msra.gmra.mrb[12].mxu0 %vm1167_vm3, %v1162_v56 }
 0x232   : > { %2405 = vmatprep.mubr.msk.bf16.mxu0 %vm2671_vm1, %v2670_v2 }
 0x2f4   : > { %v1208_v57 = vpop.f32.mrb[4].mxu0  ;;  %v1300_v58 = vpop.f32.mrb[0].mxu1 }
 0x2f5   : > { %v1352_v59 = vmul.f32 0.35355338, %v1208_v57  ;;  %v1354_v60 = vmul.f32 0.35355338, %v1300_v58  ;;  %v2377_v61 = vpop.f32.mrb[5].mxu0  ;;  %v2389_v62 = vpop.f32.mrb[1].mxu1 }
 0x2f6   : > { %v1211_v63 = vpop.f32.mrb[6].mxu0  ;;  %v1303_v0 = vpop.f32.mrb[2].mxu1 }
 0x2f7   : > { %v2378_v1 = vpop.f32.mrb[7].mxu0  ;;  %v2390_v3 = vpop.f32.mrb[3].mxu1  ;;  %v1362_v5 = vsel %vm1167_vm3, %v1354_v60, -inf  ;;  %v1356_v6 = vsel %vm1167_vm3, %v1352_v59, -inf }
 0x2f8   : > { %1363 = vmax.xlane.f32.xlu0 %v1362_v5  ;;  %1357 = vmax.xlane.f32.xlu1 %v1356_v6 }
 0x2fc   : > { %v1254_v7 = vpop.f32.mrb[8].mxu0 }
 0x2fd   : > { %v1353_v9 = vmul.f32 0.35355338, %v1254_v7  ;;  %v2383_v10 = vpop.f32.mrb[9].mxu0 }
 0x2fe   : > { %v1257_v11 = vpop.f32.mrb[10].mxu0 }
 0x2ff   : > { %v2384_v15 = vpop.f32.mrb[11].mxu0  ;;  %v1359_v16 = vsel %vm1167_vm3, %v1353_v9, -inf }
 0x300   : > { %1360 = vmax.xlane.f32.xlu0 %v1359_v16 }
 0x304   : > { %v1346_v17 = vpop.f32.mrb[12].mxu0 }
 0x305   : > { %v1355_v18 = vmul.f32 0.35355338, %v1346_v17  ;;  %v2395_v19 = vpop.f32.mrb[13].mxu0 }
 0x306   : > { %v1349_v20 = vpop.f32.mrb[14].mxu0 }
 0x307   : > { %v2396_v21 = vpop.f32.mrb[15].mxu0  ;;  %v1365_v22 = vsel %vm1167_vm3, %v1355_v18, -inf }
 0x308   : > { %1366 = vmax.xlane.f32.xlu1 %v1365_v22 }
 0x316   : > { %1011 = vrot.lane.b32.xlu0 %v2910_v8, %s2678_s22 }
 0x319   : > { %1013 = vrot.lane.b32.xlu1 %v2916_v12, %s2678_s22 }
 0x385   : > { %v1358_v23 = vpop.xlane.xlu1 %1357  ;;  %v1364_v27 = vpop.xlane.xlu0 %1363 }
 0x386   : > { %v1368_v25 = vsub.f32 %v1352_v59, %v1358_v23  ;;  %v1370_v37 = vsub.f32 %v1354_v60, %v1364_v27 }
 0x388   : > { %v1372_v26 = vmul.f32 1.442695, %v1368_v25  ;;  %v1376_v38 = vmul.f32 1.442695, %v1370_v37 }
 0x38a   : > { %2554 = vpow2.f32 %v1372_v26 }
 0x38d   : > { %v1361_v28 = vpop.xlane.xlu0 %1360 }
 0x38e   : > { %v1369_v29 = vsub.f32 %v1353_v9, %v1361_v28 }
 0x390   : > { %v1374_v30 = vmul.f32 1.442695, %v1369_v29 }
 0x392   : > { %2556 = vpow2.f32 %v1374_v30 }
 0x394   : > { %v2995_v31 = vpop.eup %2554 }
 0x395   : > { %v1380_v32 = vsel %vm1167_vm3, %v2995_v31, 0.0  ;;  %v1367_v12 = vpop.xlane.xlu1 %1366 }
 0x396   : > { %1381 = vadd.xlane.f32.xlu0 %v1380_v32  ;;  %v1371_v35 = vsub.f32 %v1355_v18, %v1367_v12 }
 0x398   : > { %v1378_v36 = vmul.f32 1.442695, %v1371_v35 }
 0x399   : > { %v1014_v43 = vpop.permute.xlu1 %1013 }
 0x39a   : > { %2558 = vpow2.f32 %v1378_v36 }
 0x39b   : > { %2560 = vpow2.f32 %v1376_v38 }
 0x39c   : > { %v2999_v33 = vpop.eup %2556 }
 0x39d   : > { %v1383_v8 = vsel %vm1167_vm3, %v2999_v33, 0.0 }
 0x39e   : > { %1384 = vadd.xlane.f32.xlu1 %v1383_v8 }
 0x3a4   : > { %v3005_v39 = vpop.eup %2558 }
 0x3a5   : > { %v1389_v40 = vsel %vm1167_vm3, %v3005_v39, 0.0  ;;  %v3009_v41 = vpop.eup %2560 }
 0x3ac   : > { %1017 = vrot.lane.b32.xlu0 %v2919_v13, %s2678_s22  ;;  %v1386_v13 = vsel %vm1167_vm3, %v3009_v41, 0.0 }
 0x3af   : > { %1015 = vrot.lane.b32.xlu1 %v2921_v14, %s2678_s22  ;;  %v1012_v14 = vpop.permute.xlu0 %1011 }
 0x3cb   : > { %1390 = vadd.xlane.f32.xlu0 %v1389_v40 }
 0x3d3   : > { %1387 = vadd.xlane.f32.xlu1 %v1386_v13 }
 0x423   : > { %v1382_v42 = vpop.xlane.xlu0 %1381 }
 0x424   : > { %2562 = vrcp.f32 %v1382_v42 }
 0x427   : > { %v1018_v44 = vpop.permute.xlu0 %1017 }
 0x428   : > { %v1039_v46 = vcombine.low %v1014_v43, %v1018_v44  ;;  %v1040_v47 = vcombine.high %v1014_v43, %v1018_v44 }
 0x42a   : > { %v1047_v51 = vrot.slane %v1039_v46, %v2929_v24  ;;  %v1054_v52 = vrot.slane %v1040_v47, %v2929_v24 }
 0x42b   : > { %v1385_v45 = vpop.xlane.xlu1 %1384 }
 0x42c   : > { %2564 = vrcp.f32 %v1385_v45 }
 0x42e   : > { %v2563_v17 = vpop.eup %2562 }
 0x42f   : > { %v1016_v48 = vpop.permute.xlu1 %1015  ;;  %v1396_v28 = vmul.f32 %v2563_v17, %v2995_v31 }
 0x430   : > { %v1023_v49 = vcombine.low %v1012_v14, %v1016_v48  ;;  %v1024_v50 = vcombine.high %v1012_v14, %v1016_v48 }
 0x431   : > { %v1400_v37 = vpack.c.bf16 %v1396_v28, %v1396_v28 }
 0x432   : > { %v1031_v53 = vrot.slane %v1023_v49, %v2929_v24  ;;  %v1038_v54 = vrot.slane %v1024_v50, %v2929_v24 }
 0x434   : > { %v1055_v55 = vcombine.low %v1031_v53, %v1047_v51  ;;  %v1056_v56 = vcombine.high %v1031_v53, %v1047_v51  ;;  %v1071_v57 = vcombine.low %v1038_v54, %v1054_v52  ;;  %v1072_v58 = vcombine.high %v1038_v54, %v1054_v52 }
 0x436   : > { %v1063_v59 = vrot.slane %v1055_v55, %v2939_v34  ;;  %v1070_v60 = vrot.slane %v1056_v56, %v2939_v34  ;;  %v1079_v61 = vrot.slane %v1071_v57, %v2939_v34  ;;  %v1086_v62 = vrot.slane %v1072_v58, %v2939_v34  ;;  %v2565_v22 = vpop.eup %2564 }
 0x437   : > { %v1397_v29 = vmul.f32 %v2565_v22, %v2999_v33 }
 0x438   : > { %v1091_v63 = vcombine.low %v1063_v59, %v1070_v60  ;;  %v2289_v0 = vcombine.high %v1063_v59, %v1070_v60  ;;  %v1107_v1 = vcombine.low %v1079_v61, %v1086_v62  ;;  %v2290_v3 = vcombine.high %v1079_v61, %v1086_v62 }
 0x439   : > { %v1401_v38 = vpack.c.bf16 %v1397_v29, %v1397_v29 }
 0x43a   : > { %v1098_v5 = vrot.slane %v1091_v63, %v2929_v24  ;;  %v1106_v6 = vrot.slane %v2289_v0, %v2929_v24  ;;  %v1114_v7 = vrot.slane %v1107_v1, %v2929_v24  ;;  %v1122_v9 = vrot.slane %v2290_v3, %v2929_v24 }
 0x43c   : > { %v1123_v10 = vcombine.low %v1098_v5, %v1106_v6  ;;  %v1139_v11 = vcombine.low %v1114_v7, %v1122_v9  ;;  %v1124_v15 = vcombine.high %v1098_v5, %v1106_v6  ;;  %v1140_v16 = vcombine.high %v1114_v7, %v1122_v9 }
 0x43e   : > { %v1131_v18 = vrot.slane %v1123_v10, %v2939_v34  ;;  %v1147_v19 = vrot.slane %v1139_v11, %v2939_v34  ;;  %v1138_v20 = vrot.slane %v1124_v15, %v2939_v34  ;;  %v1154_v21 = vrot.slane %v1140_v16, %v2939_v34  ;;  %v2542_v15 = vld [vmem:[%s2847_s29] sm:$0xff]  }
 0x440   : > { %v1155_v23 = vcombine.low %v1131_v18, %v1147_v19  ;;  %v1156_v25 = vcombine.high %v1131_v18, %v1147_v19  ;;  %v1157_v26 = vcombine.low %v1138_v20, %v1154_v21  ;;  %v1158_v27 = vcombine.high %v1138_v20, %v1154_v21 }
 0x442   : > { %v1404_v30 = vpack.c.bf16 %v1155_v23, %v1155_v23  ;;  %v1405_v32 = vpack.c.bf16 %v1156_v25, %v1156_v25  ;;  %v1406_v35 = vpack.c.bf16 %v1157_v26, %v1157_v26  ;;  %v1407_v36 = vpack.c.bf16 %v1158_v27, %v1158_v27  ;;  %v2543_v25 = vld [vmem:[%s2847_s29 + $0x8] sm:$0xff]   ;;  %s2679_s29 = smov 16  }
 0x444   : > { %v1413_v8 = vsel %vm1411_vm4, %v1404_v30, 0  ;;  %v1459_v12 = vsel %vm1411_vm4, %v1405_v32, 0  ;;  %v1505_v31 = vsel %vm1411_vm4, %v1406_v35, 0  ;;  %v1551_v33 = vsel %vm1411_vm4, %v1407_v36, 0 }
 0x445   : > { %2398 = vmatpush3.bf16.msra.mxu1 %v1413_v8  ;;  %2404 = vmatpush3.bf16.msra.mxu0 %v1459_v12 }
 0x446   : > { %2409 = vmatprep.subr.bf16.mxu1 %v2670_v2  ;;  %2415 = vmatprep.subr.bf16.mxu0 %v2670_v2 }
 0x448   : > { %2400 = vmatmul.mubr.msk.bf16.vlgmr.msra.gmra.mrb[4].mxu1 %vm1167_vm3, %v1400_v37  ;;  %2406 = vmatmul.mubr.msk.bf16.vlgmr.msra.gmra.mrb[16].mxu0 %vm1167_vm3, %v1401_v38 }
 0x449   : > { %2410 = vmatpush3.bf16.msra.mxu1 %v1505_v31  ;;  %2416 = vmatpush3.bf16.msra.mxu0 %v1551_v33 }
 0x44a   : > { %2417 = vmatprep.mubr.msk.bf16.mxu0 %vm2671_vm1, %v2670_v2  ;;  %2411 = vmatprep.mubr.msk.bf16.mxu1 %vm2671_vm1, %v2670_v2 }
 0x44b   : > { %2421 = vmatprep.subr.bf16.mxu1 %v2670_v2  ;;  %2429 = vmatprep.subr.bf16.mxu0 %v2670_v2 }
 0x458   : > { %v1391_v40 = vpop.xlane.xlu0 %1390 }
 0x459   : > { %2566 = vrcp.f32 %v1391_v40 }
 0x460   : > { %v1388_v13 = vpop.xlane.xlu1 %1387 }
 0x461   : > { %2568 = vrcp.f32 %v1388_v13 }
 0x463   : > { %v2567_v14 = vpop.eup %2566 }
 0x464   : > { %v1399_v42 = vmul.f32 %v2567_v14, %v3005_v39 }
 0x466   : > { %v1403_v43 = vpack.c.bf16 %v1399_v42, %v1399_v42 }
 0x468   : > { %2418 = vmatmul.mubr.msk.bf16.vlgmr.msra.gmra.mrb[20].mxu0 %vm1167_vm3, %v1403_v43 }
 0x469   : > { %2433 = vmatprep.mubr.msk.bf16.mxu0 %vm2671_vm1, %v2670_v2 }
 0x46b   : > { %v2569_v44 = vpop.eup %2568 }
 0x46c   : > { %v1398_v45 = vmul.f32 %v2569_v44, %v3009_v41 }
 0x46e   : > { %v1402_v46 = vpack.c.bf16 %v1398_v45, %v1398_v45 }
 0x470   : > { %2412 = vmatmul.mubr.msk.bf16.vlgmr.msra.gmra.mrb[8].mxu1 %vm1167_vm3, %v1402_v46  ;;  %v2301_v46 = vld [vmem:[%s3253_s20] ss:$0 sm:$0xff] }
 0x471   : > { %2425 = vmatprep.mubr.msk.bf16.mxu1 %vm2671_vm1, %v2670_v2  ;;  %2422 = vmatpush3.bf16.msra.mxu1 %v2542_v15 }
 0x472   : > { %2423 = vmatprep.subr.bf16.mxu1 %v2670_v2 }
 0x475   : > { %2424 = vmatpush3.bf16.msra.mxu1 %v2543_v25 }
 0x476   : > { %2437 = vmatprep.subr.bf16.mxu1 %v2670_v2 }
 0x51b   : > { %v1449_v47 = vpop.f32.mrb[4].mxu1  ;;  %v1495_v48 = vpop.f32.mrb[16].mxu0 }
 0x51c   : > { %v2401_v49 = vpop.f32.mrb[5].mxu1  ;;  %v2407_v50 = vpop.f32.mrb[17].mxu0 }
 0x51d   : > { %v1452_v39 = vpop.f32.mrb[6].mxu1  ;;  %v1498_v51 = vpop.f32.mrb[18].mxu0 }
 0x51e   : > { %v2402_v52 = vpop.f32.mrb[7].mxu1  ;;  %v2408_v53 = vpop.f32.mrb[19].mxu0 }
 0x53b   : > { %v1587_v54 = vpop.f32.mrb[20].mxu0 }
 0x53c   : > { %v1609_v55 = vcombine.low %v1495_v48, %v1587_v54  ;;  %v1610_v56 = vcombine.high %v1495_v48, %v1587_v54  ;;  %v2419_v57 = vpop.f32.mrb[21].mxu0 }
 0x53d   : > { %v1590_v58 = vpop.f32.mrb[22].mxu0 }
 0x53e   : > { %v2420_v41 = vpop.f32.mrb[23].mxu0  ;;  %v1617_v0 = vrot.slane %v1609_v55, %v2929_v24  ;;  %v1624_v1 = vrot.slane %v1610_v56, %v2929_v24  ;;  %v2544_v58 = vld [vmem:[%s2864_s15] sm:$0xff]  }
 0x53f   : > { %2430 = vmatpush3.bf16.msra.mxu0 %v2544_v58  ;;  %v2545_v41 = vld [vmem:[%s2864_s15 + $0x8] sm:$0xff]  }
 0x540   : > { %2431 = vmatprep.subr.bf16.mxu0 %v2670_v2 }
 0x543   : > { %v1541_v59 = vpop.f32.mrb[8].mxu1  ;;  %2432 = vmatpush3.bf16.msra.mxu0 %v2545_v41 }
 0x544   : > { %v1593_v60 = vcombine.low %v1449_v47, %v1541_v59  ;;  %v1594_v61 = vcombine.high %v1449_v47, %v1541_v59  ;;  %v2413_v62 = vpop.f32.mrb[9].mxu1  ;;  %v2547_v59 = vld [vmem:[%s2878_s0 + $0x8] sm:$0xff]  }
 0x545   : > { %v1544_v63 = vpop.f32.mrb[10].mxu1  ;;  %v2550_v62 = vld [vmem:[%s2878_s0 + $0x20] sm:$0xff]  }
 0x546   : > { %v1601_v3 = vrot.slane %v1593_v60, %v2929_v24  ;;  %v1608_v5 = vrot.slane %v1594_v61, %v2929_v24  ;;  %v2414_v6 = vpop.f32.mrb[11].mxu1  ;;  %v2548_v60 = vld [vmem:[%s2878_s0 + $0x10] sm:$0xff]   ;;  %v2549_v61 = vld [vmem:[%s2878_s0 + $0x18] sm:$0xff]   ;;  %v2551_v63 = vld [vmem:[%s2878_s0 + $0x28] sm:$0xff]  }
 0x547   : > { %v2305_v6 = vld [vmem:[%s3254_s21] ss:$0 sm:$0xff] }
 0x548   : > { %v1625_v7 = vcombine.low %v1601_v3, %v1617_v0  ;;  %v1626_v9 = vcombine.high %v1601_v3, %v1617_v0  ;;  %v1641_v10 = vcombine.low %v1608_v5, %v1624_v1  ;;  %v1642_v11 = vcombine.high %v1608_v5, %v1624_v1 }
 0x54a   : > { %v1633_v16 = vrot.slane %v1625_v7, %v2939_v34  ;;  %v1640_v17 = vrot.slane %v1626_v9, %v2939_v34  ;;  %v1649_v18 = vrot.slane %v1641_v10, %v2939_v34  ;;  %v1656_v19 = vrot.slane %v1642_v11, %v2939_v34  ;;  %v2306_v9 = vld [vmem:[%s3255_s28] ss:$0 sm:$0xff] }
 0x54c   : > { %v1661_v20 = vcombine.low %v1633_v16, %v1640_v17  ;;  %v2299_v21 = vcombine.high %v1633_v16, %v1640_v17  ;;  %v1677_v22 = vcombine.low %v1649_v18, %v1656_v19  ;;  %v2300_v23 = vcombine.high %v1649_v18, %v1656_v19  ;;  %v2552_v16 = vld [vmem:[%s2878_s0 + $0x30] sm:$0xff]   ;;  %v2553_v17 = vld [vmem:[%s2878_s0 + $0x38] sm:$0xff]   ;;  %v2307_v18 = vld [vmem:[%s625_s13] ss:$0 sm:$0xff] }
 0x54e   : > { %v1668_v26 = vrot.slane %v1661_v20, %v2929_v24  ;;  %v1676_v27 = vrot.slane %v2299_v21, %v2929_v24  ;;  %v1684_v28 = vrot.slane %v1677_v22, %v2929_v24  ;;  %v1692_v29 = vrot.slane %v2300_v23, %v2929_v24 }
 0x550   : > { %v1694_v30 = vcombine.high %v1668_v26, %v1676_v27  ;;  %v1710_v32 = vcombine.high %v1684_v28, %v1692_v29  ;;  %v1693_v8 = vcombine.low %v1668_v26, %v1676_v27  ;;  %v1709_v12 = vcombine.low %v1684_v28, %v1692_v29 }
 0x552   : > { %v1708_v35 = vrot.slane %v1694_v30, %v2939_v34  ;;  %v1724_v36 = vrot.slane %v1710_v32, %v2939_v34  ;;  %v1701_v37 = vrot.slane %v1693_v8, %v2939_v34  ;;  %v1717_v38 = vrot.slane %v1709_v12, %v2939_v34 }
 0x554   : > { %v1727_v31 = vcombine.low %v1708_v35, %v1724_v36  ;;  %v1726_v33 = vcombine.high %v1701_v37, %v1717_v38  ;;  %v1728_v40 = vcombine.high %v1708_v35, %v1724_v36  ;;  %v1725_v13 = vcombine.low %v1701_v37, %v1717_v38 }
 0x556   : > { %1734 = vrot.lane.b32.xlu1 %v1727_v31, %s2679_s29  ;;  %1730 = vrot.lane.b32.xlu0 %v1726_v33, %s2680_s12 }
 0x55a   : > { %1738 = vrot.lane.b32.xlu1 %v1728_v40, %s2681_s27 }
 0x5c8   : > { %v1735_v24 = vpop.permute.xlu1 %1734  ;;  %v1731_v14 = vpop.permute.xlu0 %1730 }
 0x5c9   : > { %v1741_v42 = vsel %vm1167_vm3, %v1725_v13, %v1731_v14  ;;  %v2320_v14 = vld [vmem:[%s636_s1] ss:$0 sm:$0xff] }
 0x5ca   : > { %v1743_v44 = vsel %vm1742_vm5, %v1741_v42, %v1735_v24 }
 0x5cc   : > { %v1739_v43 = vpop.permute.xlu1 %1738 }
 0x5cd   : > { %v1745_v34 = vsel %vm1744_vm6, %v1743_v44, %v1739_v43  ;;  %v2321_v43 = vld [vmem:[%s639_s7] ss:$0 sm:$0xff] }
 0x5ce   : > { %v1746_v45 = vpack.c.bf16 %v1745_v34, %v1745_v34 }
 0x5d0   : > { %2426 = vmatmul.mubr.msk.bf16.vlgmr.msra.gmra.mrb[12].mxu1 %vm673_vm2, %v1746_v45 }
 0x5d1   : > { %2453 = vmatprep.mubr.msk.bf16.mxu1 %vm2671_vm1, %v2670_v2 }
 0x6a3   : > { %v1807_v47 = vpop.f32.mrb[12].mxu1 }
 0x6a4   : > { %v1808_v48 = vadd.f32 %v2301_v46, %v1807_v47  ;;  %v2427_v49 = vpop.f32.mrb[13].mxu1 }
 0x6a5   : > { %v1810_v50 = vpop.f32.mrb[14].mxu1 }
 0x6a6   : > { %v2428_v39 = vpop.f32.mrb[15].mxu1  ;;  %v1813_v51 = vadd.f32 %v1808_v48, %v2894_v4  ;;  %v2546_v4 = vld [vmem:[%s2878_s0] sm:$0xff]  }
 0x6a7   : > { %2438 = vmatpush3.bf16.msra.mxu1 %v2546_v4 }
 0x6a8   : > { %v1816_v52 = vsel %vm673_vm2, %v1813_v51, 0.0  ;;  %2439 = vmatprep.subr.bf16.mxu1 %v2670_v2 }
 0x6a9   : > { %1817 = vadd.xlane.f32.xlu0 %v1816_v52 }
 0x6ab   : > { %2440 = vmatpush3.bf16.msra.mxu1 %v2547_v59 }
 0x6ac   : > { %2441 = vmatprep.subr.bf16.mxu1 %v2670_v2 }
 0x6af   : > { %2442 = vmatpush3.bf16.msra.mxu1 %v2548_v60 }
 0x6b0   : > { %2443 = vmatprep.subr.bf16.mxu1 %v2670_v2 }
 0x6b3   : > { %2444 = vmatpush3.bf16.msra.mxu1 %v2549_v61 }
 0x6b4   : > { %2445 = vmatprep.subr.bf16.mxu1 %v2670_v2 }
 0x6b7   : > { %2446 = vmatpush3.bf16.msra.mxu1 %v2550_v62 }
 0x6b8   : > { %2447 = vmatprep.subr.bf16.mxu1 %v2670_v2 }
 0x6bb   : > { %2448 = vmatpush3.bf16.msra.mxu1 %v2551_v63 }
 0x6bc   : > { %2449 = vmatprep.subr.bf16.mxu1 %v2670_v2 }
 0x6bf   : > { %2450 = vmatpush3.bf16.msra.mxu1 %v2552_v16 }
 0x6c0   : > { %2451 = vmatprep.subr.bf16.mxu1 %v2670_v2  ;;  %v2311_v2 = vld [vmem:[%s633_s19] ss:$0 sm:$0xff] }
 0x6c3   : > { %2452 = vmatpush3.bf16.msra.mxu1 %v2553_v17 }
 0x736   : > { %v1818_v53 = vpop.xlane.xlu0 %1817 }
 0x737   : > { %v1820_v54 = vmul.f32 0.03125, %v1818_v53 }
 0x739   : > { %v1821_v55 = vsub.f32 %v1813_v51, %v1820_v54 }
 0x73b   : > { %v1822_v56 = vmul.f32 %v1821_v55, %v1821_v55 }
 0x73d   : > { %v1823_v57 = vsel %vm673_vm2, %v1822_v56, 0.0 }
 0x73e   : > { %1824 = vadd.xlane.f32.xlu1 %v1823_v57 }
 0x7cb   : > { %v1825_v0 = vpop.xlane.xlu1 %1824 }
 0x7cc   : > { %v1826_v1 = vmul.f32 0.03125, %v1825_v0 }
 0x7ce   : > { %v1827_v3 = vadd.f32 1e-05, %v1826_v1 }
 0x7d0   : > { %2570 = vrsqrt.f32 %v1827_v3 }
 0x7da   : > { %v2571_v5 = vpop.eup %2570 }
 0x7db   : > { %v1829_v7 = vmul.f32 %v2571_v5, %v1821_v55 }
 0x7dd   : > { %v1836_v10 = vmul.f32 %v2305_v6, %v1829_v7 }
 0x7df   : > { %v1843_v11 = vadd.f32 %v2306_v9, %v1836_v10 }
 0x7e1   : > { %v1844_v15 = vpack.c.bf16 %v1843_v11, %v1843_v11 }
 0x7e3   : > { %2434 = vmatmul.mubr.msk.bf16.vlgmr.msra.gmra.mrb[24].mxu0 %vm673_vm2, %v1844_v15 }
 0x8b6   : > { %v1905_v19 = vpop.f32.mrb[24].mxu0 }
 0x8b7   : > { %v1906_v20 = vadd.f32 %v2307_v18, %v1905_v19  ;;  %v2435_v21 = vpop.f32.mrb[25].mxu0 }
 0x8b8   : > { %v1908_v22 = vpop.f32.mrb[26].mxu0 }
 0x8b9   : > { %v1911_v23 = vmax.f32 %v1906_v20, 0.0  ;;  %v2436_v25 = vpop.f32.mrb[27].mxu0 }
 0x8bb   : > { %v1912_v26 = vpack.c.bf16 %v1911_v23, %v1911_v23 }
 0x8bd   : > { %2454 = vmatmul.mubr.bf16.vlgmr.msra.gmra.mrb[16].mxu1 %v1912_v26 }
 0x990   : > { %v2018_v27 = vpop.f32.mrb[16].mxu1 }
 0x991   : > { %v2019_v28 = vadd.f32 %v2311_v2, %v2018_v27  ;;  %v2455_v29 = vpop.f32.mrb[17].mxu1 }
 0x992   : > { %v2021_v30 = vpop.f32.mrb[18].mxu1 }
 0x993   : > { %v2456_v32 = vpop.f32.mrb[19].mxu1  ;;  %v2024_v8 = vadd.f32 %v2019_v28, %v1843_v11 }
 0x995   : > { %v2027_v12 = vsel %vm673_vm2, %v2024_v8, 0.0 }
 0x996   : > { %2028 = vadd.xlane.f32.xlu0 %v2027_v12 }
 0xa23   : > { %v2029_v35 = vpop.xlane.xlu0 %2028 }
 0xa24   : > { %v2030_v36 = vmul.f32 0.03125, %v2029_v35 }
 0xa26   : > { %v2031_v37 = vsub.f32 %v2024_v8, %v2030_v36 }
 0xa28   : > { %v2032_v38 = vmul.f32 %v2031_v37, %v2031_v37 }
 0xa2a   : > { %v2033_v31 = vsel %vm673_vm2, %v2032_v38, 0.0 }
 0xa2b   : > { %2034 = vadd.xlane.f32.xlu0 %v2033_v31 }
 0xab8   : > { %v2035_v33 = vpop.xlane.xlu0 %2034 }
 0xab9   : > { %v2036_v40 = vmul.f32 0.03125, %v2035_v33 }
 0xabb   : > { %v2037_v13 = vadd.f32 1e-05, %v2036_v40 }
 0xabd   : > { %2572 = vrsqrt.f32 %v2037_v13 }
 0xac7   : > { %v2573_v24 = vpop.eup %2572 }
 0xac8   : > { %v2039_v42 = vmul.f32 %v2573_v24, %v2031_v37  ;;  %2058 = sbr.rel (%p2322_p1) target bundleno = 2775 (0xad7), region = 80 }
 0xaca   : > { %v2046_v44 = vmul.f32 %v2320_v14, %v2039_v42 }
 0xacc   : > { %v2053_v34 = vadd.f32 %v2321_v43, %v2046_v44 }
 0xace   : > { %2054 = vst.msk [vmem:[#allocation2] sm:$0xff] %vm673_vm2, %v2053_v34 }
 0xad5   : > { %v2059_v45 = vld [vmem:[#allocation2] sm:$0xff] }
 0xad6   : > { %2060 = vst.msk [vmem:[%s591_s26] sm:$0xff] %vm673_vm2, %v2059_v45 }
 0xad7 PF: > { %s3258_s1 = sld [smem:[#allocation10_spill]]  ;;  %s3259_s25 = sld [smem:[#allocation7_spill]] }
 0xad8   : > { %s3261_s3 = sld [smem:[#allocation24_spill]]  ;;  %s2075_s16 = sshll.u32 %s591_s26, 4  ;;  %s2076_s16 = int_to_ptr.vmem [resolvable:$true] %s2075_s16 }
 0xad9   : > { %s2574_s18 = scalar_lea.vmem %s2076_s16, 128  ;;  %s2682_s23 = smov [#allocation3]  }
 0xada   : > { %p2575_p2 = scmp.ne.s32.totalorder %s2076_s16, %s2574_s18  ;;  %s2578_s22 = sshll.u32 %s2682_s23, 4  ;;  %s2579_s22 = int_to_ptr.vmem [resolvable:$false] %s2578_s22 }
 0xadb   : > { %s2580_s29 = scalar_lea.vmem %s2579_s22, 256  ;;  %p2581_p6 = scmp.lt.s32.totalorder %s2076_s16, %s2579_s22 }
 0xadc   : > { %p2576_p4 = pnand %p2575_p2, %p2802_p3  ;;  %p2582_p7 = scmp.lt.s32.totalorder %s2580_s29, %s2574_s18 }
 0xadd   : > { %s2324_s15 = sshll.u32 %s3258_s1, 7  ;;  %s3262_s24 = sand.u32 1, %s3259_s25  }
 0xade   : > { %s3145_s21 = scalar_lea.hbm %s3261_s3, %s2324_s15  ;;  %s2062_s28 = scalar_lea.sflag [#allocation4], %s3262_s24 }
 0xadf   : > { %p2577_p5 = pneg %p2576_p4  ;;  %p2583_p8 = por %p2582_p7, %p2581_p6 }
 0xae1   : > { %p2584_p10 = pnand %p2583_p8, %p2577_p5 }
 0xae3   : > { %2587 = shalt.err (!%p2584_p10)
}
 0xae4   : > { %s2588_s17 = scalar_lea.hbm %s3145_s21, 128  ;;  %s2592_s13 = scalar_lea.hbm %s3261_s3, 256 }
 0xae5   : > { %p2589_p11 = scmp.ne.s32.totalorder %s3145_s21, %s2588_s17  ;;  %p2593_p0 = scmp.lt.u32.totalorder %s3145_s21, %s3261_s3 }
 0xae6   : > { %p2594_p1 = scmp.lt.u32.totalorder %s2592_s13, %s2588_s17  ;;  %p2596_p4 = scmp.lt.u32.totalorder %s2588_s17, %s3145_s21 }
 0xae7   : > { %p2590_p12 = pnand %p2589_p11, %p2802_p3 }
 0xae8   : > { %p2595_p2 = por %p2594_p1, %p2593_p0 }
 0xae9   : > { %p2591_p13 = pneg %p2590_p12 }
 0xaea   : > { %p2597_p5 = por %p2596_p4, %p2595_p2 }
 0xaec   : > { %p2598_p6 = pnand %p2597_p5, %p2591_p13 }
 0xaee   : > { %2601 = shalt.err (!%p2598_p6)
}
 0xaef   : > { %2457 = dma.vmem_to_hbm [thread:$0]  (%p2802_p3), %s2076_s16, 128, %s3145_s21, %s2062_s28  }
 0xaf0 PF: > { %s3263_s27 = sld [smem:[#allocation13_spill]]  ;;  %s3264_s14 = sld [smem:[#allocation6_spill]] }
 0xaf6   : > { %p2463_p7 = scmp.ge.s32.totalorder %s3263_s27, 2  ;;  %s2087_s25 = sand.u32 1, %s3264_s14  }
 0xaf7   : > { %s2088_s15 = scalar_lea.sflag [#allocation4], %s2087_s25 }
 0xaf8   : > { %p2460_p8 = pnand %p2463_p7, %p2812_p9 }
 0xafa   : > { %2635 = dma.done.wait (!%p2460_p8), %s2088_s15, 128  }
 0xafb   : > { %2637 = vsyncadd (!%p2460_p8), %s2088_s15, 4294967168  ;;  %s26_s15 = sadd.s32 1, %s3263_s27   ;;  %s3266_s25 = sld [smem:[#allocation7_spill]] }
 0xafc   : > { %p23_p10 = scmp.ge.s32.totalorder %s26_s15, 6   ;;  %s3267_s26 = sld [smem:[#allocation8_spill]] }
 0xafd   : > { %s3268_s27 = sld [smem:[#allocation18_spill]]  ;;  %s3269_s28 = sld [smem:[#allocation11_spill]] }
 0xafe   : > { %s3270_s29 = sld [smem:[#allocation12_spill]]  ;;  %s3271_s30 = sld [smem:[#allocation14_spill]] }
 0xaff   : > { %s3272_s14 = sld [smem:[#allocation16_spill]]  ;;  %25 = sbr.rel (!%p23_p10) target bundleno = 12 (0xc), region = 151 }
 0xb06   :  { %2093 = vsyncpa [#allocation4], 1 }
 0xb07   :  { %2095 = vsyncpa [#allocation4 + $0x1], 1 }

</bundles_post_ra>
